<compile_context>
chip_gen: v7x
topology: tpu7x:2x2x1
jax: 0.10.0
libtpu: 0.0.40
codegen_flags: <defaults>
</compile_context>

<pallas_src>
import functools

import jax
import jax.numpy as jnp
from jax import lax
from jax.experimental import pallas as pl
from jax.experimental.pallas import tpu as pltpu


# ~12 MiB of VMEM per (pred + target) buffer slot; x2 double-buffering plus one
# pred-sized matmul temporary stays comfortably under the 48 MiB scoped limit.
_BUFFER_BUDGET_BYTES = 12 * 1024 * 1024
_VMEM_LIMIT_BYTES = 48 * 1024 * 1024


def _detect_num_shards():
    """2 shards (one per TensorCore) on v7x; 1 on single-TC chips (v5e/v6e)."""
    try:
        kind = jax.devices()[0].device_kind.lower()
    except Exception:
        return 1
    return 2 if "7" in kind else 1


def _nll_kernel(pred_ref, tgt_ref, out_ref, acc_ref, *,
                rows_per_block, valid_rows, tiles_per_shard, group, n_classes):
    """One grid step: add sum_r pred[r, target[r]] for this tile into acc.

    pred_ref : (PR, W) block of pred in its native dtype.
               packed path : W = group * n_classes = 128; each block row carries
               `group` original rows side by side on the lane axis.
               generic path: group == 1, W = n_classes.
    tgt_ref  : (PR, group) int32 block.
               packed path : absolute lane index of the picked class per sub-row.
               generic path: the class index per row.
    out_ref  : (8, 128) per-shard partial-sum output (broadcast-filled once).
    acc_ref  : (1, W) f32 running partial sums (VMEM scratch).
    """
    s = pl.program_id(0)
    i = pl.program_id(1)

    @pl.when(i == 0)
    def _():
        acc_ref[...] = jnp.zeros_like(acc_ref)

    p = pred_ref[...].astype(jnp.float32)            # native-dtype stream, upcast per tile
    t = tgt_ref[...]                                 # (PR, group) int32
    pr, w = p.shape

    # Rows at or beyond `valid_rows` are ragged-tail garbage (including fully
    # clamped blocks); force their target to -1 so they can never match a lane.
    row_start = (s * tiles_per_shard + i) * rows_per_block
    row_ids = row_start + lax.broadcasted_iota(jnp.int32, t.shape, 0)
    t_safe = jnp.where(row_ids < valid_rows, t, -1)

    lane = lax.broadcasted_iota(jnp.int32, (pr, w), 1)
    if group == 1:
        mask = lane == t_safe                        # (PR, C) vs (PR, 1) broadcast
    else:
        # Expand each sub-row's absolute target lane across its C lanes with a
        # tiny constant 0/1 matmul (runs on the otherwise-idle MXU), so the VPU
        # only does compare/select/accumulate on fully lane-dense vregs.
        r_iota = lax.broadcasted_iota(jnp.int32, (group, w), 0)
        l_iota = lax.broadcasted_iota(jnp.int32, (group, w), 1)
        seg = l_iota - r_iota * n_classes
        expand = ((seg >= 0) & (seg < n_classes)).astype(jnp.float32)   # (G, W)
        t_exp = jnp.dot(t_safe.astype(jnp.float32), expand,
                        preferred_element_type=jnp.float32)             # (PR, W)
        mask = t_exp == lane.astype(jnp.float32)     # exact for small ints / -1

    picked = jnp.where(mask, p, jnp.float32(0.0))    # select, never multiplies garbage
    acc_ref[...] += jnp.sum(picked, axis=0, keepdims=True)

    @pl.when(i == pl.num_programs(1) - 1)
    def _():
        out_ref[...] = jnp.broadcast_to(jnp.sum(acc_ref[...]), out_ref.shape)


def _nll_impl(pred, target, num_shards):
    T, B, C = pred.shape
    N = T * B

    pred2 = pred.reshape(N, C)                        # free reshape, native dtype
    tgt = target.reshape(N).astype(jnp.int32)
    # TODO(synk): torch.nn.NLLLoss's default ignore_index=-100 (and its effect on
    # the mean divisor) is not handled; targets must be valid class indices.

    group = 1
    if C < 128 and 128 % C == 0 and N % (128 // C) == 0:
        group = 128 // C                              # lane-pack G rows per 128-wide row
    width = group * C
    rows = N // group

    if group > 1:
        pred_in = pred2.reshape(rows, width)          # free reshape (contiguous)
        lane_off = (jnp.arange(group, dtype=jnp.int32) * C)[None, :]
        tgt_in = tgt.reshape(rows, group) + lane_off  # absolute lane of picked class
    else:
        pred_in = pred2
        tgt_in = tgt.reshape(rows, 1)

    itemsize = jnp.dtype(pred.dtype).itemsize
    row_align = 8 if itemsize >= 4 else (16 if itemsize == 2 else 32)

    # Tiny inputs only: guarantee at least one minimal block of rows.  Large
    # inputs are never padded/copied (that full extra HBM pass was the big loss).
    rows_padded = max(rows, row_align)
    if rows_padded != rows:
        pred_in = jnp.pad(pred_in, ((0, rows_padded - rows), (0, 0)))
        tgt_in = jnp.pad(tgt_in, ((0, rows_padded - rows), (0, 0)), constant_values=-1)

    padded_w = -(-width // 128) * 128
    per_shard = -(-rows_padded // num_shards)
    pr = _BUFFER_BUDGET_BYTES // (padded_w * itemsize + 128 * 4)
    pr = min(pr, per_shard)
    pr = max(row_align, (pr // row_align) * row_align)

    total_blocks = -(-rows_padded // pr)
    tiles_per_shard = -(-total_blocks // num_shards)

    kernel = functools.partial(
        _nll_kernel,
        rows_per_block=pr, valid_rows=rows,
        tiles_per_shard=tiles_per_shard, group=group, n_classes=C)

    def block_idx(s, i):
        # Clamp so no block starts past the array; clamped blocks are fully
        # masked in the kernel (their unclamped row_start >= valid_rows).
        return (jnp.minimum(s * tiles_per_shard + i, total_blocks - 1), 0)

    if num_shards > 1:
        dims = (pltpu.CORE_PARALLEL, pltpu.ARBITRARY)  # real 2-TC split on v7x
    else:
        dims = ("arbitrary", "arbitrary")

    partials = pl.pallas_call(
        kernel,
        out_shape=jax.ShapeDtypeStruct((num_shards * 8, 128), jnp.float32),
        grid_spec=pltpu.PrefetchScalarGridSpec(
            num_scalar_prefetch=0,
            grid=(num_shards, tiles_per_shard),
            in_specs=[
                pl.BlockSpec((pr, width), block_idx),
                pl.BlockSpec((pr, group), block_idx),
            ],
            out_specs=pl.BlockSpec((8, 128), lambda s, i: (s, 0)),
            scratch_shapes=[pltpu.VMEM((1, width), jnp.float32)],
        ),
        compiler_params=pltpu.CompilerParams(
            dimension_semantics=dims,
            vmem_limit_bytes=_VMEM_LIMIT_BYTES,
        ),
    )(pred_in, tgt_in)

    # Each shard broadcast-filled its (8, 128) block with its raw partial sum.
    return -jnp.sum(partials[::8, 0]) / jnp.float32(B)


def nll_sequence_loss(pred: jax.Array, target: jax.Array) -> jax.Array:
    """pred: (T, B, C) log-probabilities; target: (T, B) integer class indices."""
    num_shards = _detect_num_shards()
    if num_shards > 1:
        try:
            return _nll_impl(pred, target, num_shards)
        except Exception:
            pass  # conservative fallback if the 2-TC split is rejected
    return _nll_impl(pred, target, 1)


def _reference(pred, target):
    # pure-JAX reference of the PyTorch module
    gathered = jnp.take_along_axis(
        pred, target[..., None].astype(jnp.int32), axis=2)[..., 0]
    per_frame = -jnp.mean(gathered, axis=1)    # NLLLoss mean over batch
    return jnp.sum(per_frame)                  # summed over frames


if __name__ == "__main__":
    key = jax.random.PRNGKey(0)
    k1, k2, k3, k4 = jax.random.split(key, 4)

    # Case 1: small-C lane-packed path (C=16 -> 8 rows per 128-wide lane row),
    # with a ragged final tile (10 packed rows streamed in 8-row blocks).
    T, B, C = 10, 8, 16
    logits = jax.random.normal(k1, (T, B, C), dtype=jnp.float32)
    pred = jax.nn.log_softmax(logits, axis=-1)
    target = jax.random.randint(k2, (T, B), 0, C, dtype=jnp.int32)

    loss = jax.block_until_ready(nll_sequence_loss(pred, target))
    ref = _reference(pred, target)
    assert jnp.allclose(loss, ref, rtol=1e-5, atol=1e-5), (loss, ref)

    # Case 2: generic path (C does not divide 128), ragged tail.
    T2, B2, C2 = 5, 6, 24
    logits2 = jax.random.normal(k3, (T2, B2, C2), dtype=jnp.float32)
    pred2 = jax.nn.log_softmax(logits2, axis=-1)
    target2 = jax.random.randint(k4, (T2, B2), 0, C2, dtype=jnp.int32)

    loss2 = jax.block_until_ready(nll_sequence_loss(pred2, target2))
    ref2 = _reference(pred2, target2)
    assert jnp.allclose(loss2, ref2, rtol=1e-5, atol=1e-5), (loss2, ref2)

    print("KERNEL_OK")
</pallas_src>

<mosaic_0001>
module attributes {stable_mosaic.version = 11 : i64} {
  func.func @_nll_kernel(%arg0: i32, %arg1: i32, %arg2: memref<8x128xf32, #tpu.memory_space<vmem>>, %arg3: memref<8x8xi32, #tpu.memory_space<vmem>>, %arg4: memref<8x128xf32, #tpu.memory_space<vmem>>, %arg5: memref<1x128xf32, #tpu.memory_space<vmem>>) attributes {dimension_semantics = [#tpu.dimension_semantics<arbitrary>, #tpu.dimension_semantics<arbitrary>], iteration_bounds = array<i64: 1, 2>, scalar_prefetch = 0 : i64, scratch_operands = 1 : i64, tpu.core_type = #tpu.core_type<tc>, window_params = [{transform_indices = @transform_0, window_bounds = array<i64: 8, 128>}, {transform_indices = @transform_1, window_bounds = array<i64: 8, 8>}, {transform_indices = @transform_2, window_bounds = array<i64: 8, 128>}]} {
    %c0_i32 = arith.constant 0 : i32
    %0 = arith.cmpi eq, %arg1, %c0_i32 : i32
    %1 = arith.extui %0 : i1 to i32
    %c0_i32_0 = arith.constant 0 : i32
    %2 = arith.cmpi ne, %1, %c0_i32_0 : i32
    scf.if %2 {
      %cst_13 = arith.constant 0.000000e+00 : f32
      %42 = vector.broadcast %cst_13 : f32 to vector<1x128xf32>
      %c0_14 = arith.constant 0 : index
      %c0_15 = arith.constant 0 : index
      %43 = vector.load %arg5[%c0_14, %c0_15] : memref<1x128xf32, #tpu.memory_space<vmem>>, vector<1x128xf32>
      tpu.vector_store %arg5[%c0_14, %c0_15], %42 {strides = array<i32>} : memref<1x128xf32, #tpu.memory_space<vmem>>, vector<1x128xf32>,
    } else {
    }
    %c0 = arith.constant 0 : index
    %c0_1 = arith.constant 0 : index
    %3 = vector.load %arg2[%c0, %c0_1] : memref<8x128xf32, #tpu.memory_space<vmem>>, vector<8x128xf32>
    %c0_2 = arith.constant 0 : index
    %c0_3 = arith.constant 0 : index
    %4 = vector.load %arg3[%c0_2, %c0_3] : memref<8x8xi32, #tpu.memory_space<vmem>>, vector<8x8xi32>
    %c2_i32 = arith.constant 2 : i32
    %5 = arith.muli %arg0, %c2_i32 : i32
    %6 = arith.addi %5, %arg1 : i32
    %c8_i32 = arith.constant 8 : i32
    %7 = arith.muli %6, %c8_i32 : i32
    %8 = tpu.iota {dimensions = array<i32: 0>} : vector<8x8xi32>
    %9 = vector.broadcast %7 : i32 to vector<8x8xi32>
    %10 = arith.addi %9, %8 : vector<8x8xi32>
    %c10_i32 = arith.constant 10 : i32
    %11 = vector.broadcast %c10_i32 : i32 to vector<8x8xi32>
    %12 = arith.cmpi slt, %10, %11 : vector<8x8xi32>
    %c-1_i32 = arith.constant -1 : i32
    %13 = vector.broadcast %c-1_i32 : i32 to vector<8x8xi32>
    %14 = arith.select %12, %4, %13 : vector<8x8xi1>, vector<8x8xi32>
    %15 = tpu.iota {dimensions = array<i32: 1>} : vector<8x128xi32>
    %16 = tpu.iota {dimensions = array<i32: 0>} : vector<8x128xi32>
    %17 = tpu.iota {dimensions = array<i32: 1>} : vector<8x128xi32>
    %c16_i32 = arith.constant 16 : i32
    %18 = vector.broadcast %c16_i32 : i32 to vector<8x128xi32>
    %19 = arith.muli %16, %18 : vector<8x128xi32>
    %20 = arith.subi %17, %19 : vector<8x128xi32>
    %c0_i32_4 = arith.constant 0 : i32
    %21 = vector.broadcast %c0_i32_4 : i32 to vector<8x128xi32>
    %22 = arith.cmpi sge, %20, %21 : vector<8x128xi32>
    %c16_i32_5 = arith.constant 16 : i32
    %23 = vector.broadcast %c16_i32_5 : i32 to vector<8x128xi32>
    %24 = arith.cmpi slt, %20, %23 : vector<8x128xi32>
    %25 = arith.andi %22, %24 : vector<8x128xi1>
    %26 = arith.extui %25 : vector<8x128xi1> to vector<8x128xi32>
    %27 = arith.sitofp %26 : vector<8x128xi32> to vector<8x128xf32>
    %28 = arith.sitofp %14 : vector<8x8xi32> to vector<8x8xf32>
    %cst = arith.constant dense<0.000000e+00> : vector<8x128xf32>
    %29 = tpu.matmul %28, %27, %cst {dimension_numbers = #tpu.dot_dimension_numbers<[1], [0], [0], [1], [0, 0, 1, 1], [], []>} : vector<8x8xf32>, vector<8x128xf32>, vector<8x128xf32> -> vector<8x128xf32>
    %30 = arith.sitofp %15 : vector<8x128xi32> to vector<8x128xf32>
    %31 = arith.cmpf oeq, %29, %30 : vector<8x128xf32>
    %cst_6 = arith.constant 0.000000e+00 : f32
    %32 = vector.broadcast %cst_6 : f32 to vector<8x128xf32>
    %33 = arith.select %31, %3, %32 : vector<8x128xi1>, vector<8x128xf32>
    %c0_7 = arith.constant 0 : index
    %c0_8 = arith.constant 0 : index
    %34 = vector.load %arg5[%c0_7, %c0_8] : memref<1x128xf32, #tpu.memory_space<vmem>>, vector<1x128xf32>
    %cst_9 = arith.constant dense<0.000000e+00> : vector<128xf32>
    %35 = vector.multi_reduction <add>, %33, %cst_9 [0] : vector<8x128xf32> to vector<128xf32>
    %36 = vector.shape_cast %35 : vector<128xf32> to vector<1x128xf32>
    %37 = arith.addf %34, %36 : vector<1x128xf32>
    %c0_10 = arith.constant 0 : index
    %c0_11 = arith.constant 0 : index
    %38 = vector.load %arg5[%c0_10, %c0_11] : memref<1x128xf32, #tpu.memory_space<vmem>>, vector<1x128xf32>
    tpu.vector_store %arg5[%c0_10, %c0_11], %37 {strides = array<i32>} : memref<1x128xf32, #tpu.memory_space<vmem>>, vector<1x128xf32>,
    %c1_i32 = arith.constant 1 : i32
    %39 = arith.cmpi eq, %arg1, %c1_i32 : i32
    %40 = arith.extui %39 : i1 to i32
    %c0_i32_12 = arith.constant 0 : i32
    %41 = arith.cmpi ne, %40, %c0_i32_12 : i32
    scf.if %41 {
      %c0_13 = arith.constant 0 : index
      %c0_14 = arith.constant 0 : index
      %42 = vector.load %arg5[%c0_13, %c0_14] : memref<1x128xf32, #tpu.memory_space<vmem>>, vector<1x128xf32>
      %43 = vector.shape_cast %42 : vector<1x128xf32> to vector<1x1x128xf32>
      %cst_15 = arith.constant dense<0.000000e+00> : vector<1xf32>
      %44 = vector.multi_reduction <add>, %43, %cst_15 [1, 2] : vector<1x1x128xf32> to vector<1xf32>
      %45 = vector.shape_cast %44 : vector<1xf32> to vector<1x1x1xf32>
      %46 = vector.extract %45[0, 0, 0] : f32 from vector<1x1x1xf32>
      %47 = vector.broadcast %46 : f32 to vector<8x128xf32>
      %c0_16 = arith.constant 0 : index
      %c0_17 = arith.constant 0 : index
      %48 = vector.load %arg4[%c0_16, %c0_17] : memref<8x128xf32, #tpu.memory_space<vmem>>, vector<8x128xf32>
      tpu.vector_store %arg4[%c0_16, %c0_17], %47 {strides = array<i32>} : memref<8x128xf32, #tpu.memory_space<vmem>>, vector<8x128xf32>,
    } else {
    }
    return
  }
  func.func @transform_0(%arg0: i32, %arg1: i32) -> (i32, i32) {
    %c2_i32 = arith.constant 2 : i32
    %0 = arith.muli %arg0, %c2_i32 : i32
    %1 = arith.addi %0, %arg1 : i32
    %c1_i32 = arith.constant 1 : i32
    %2 = arith.minsi %1, %c1_i32 : i32
    %c0_i32 = arith.constant 0 : i32
    %c0_i32_0 = arith.constant 0 : i32
    return %2, %c0_i32 : i32, i32
  }
  func.func @transform_1(%arg0: i32, %arg1: i32) -> (i32, i32) {
    %c2_i32 = arith.constant 2 : i32
    %0 = arith.muli %arg0, %c2_i32 : i32
    %1 = arith.addi %0, %arg1 : i32
    %c1_i32 = arith.constant 1 : i32
    %2 = arith.minsi %1, %c1_i32 : i32
    %c0_i32 = arith.constant 0 : i32
    %c0_i32_0 = arith.constant 0 : i32
    return %2, %c0_i32 : i32, i32
  }
  func.func @transform_2(%arg0: i32, %arg1: i32) -> (i32, i32) {
    %c0_i32 = arith.constant 0 : i32
    %c0_i32_0 = arith.constant 0 : i32
    return %arg0, %c0_i32 : i32, i32
  }
}

</mosaic_0001>

<bundles_post_ra>
// kernel: tpu_custom_call.1
= control target key start
LH: loop header
LB: loop body
LE: loop exit
PB: predicated region body
PF: predicated region fallthrough
CT: control target
= control target key end

     0   :  { %7 = vsyncpa [#allocation4], 0  ;;  %s558_s9 = smov 0   ;;  %s560_s10 = smov 0   ;;  %s630_s0 = inlined_call_operand.vmem [shape: f32[10,128], index: 0, kind: input, shape index: {}]   ;;  %s631_s1 = inlined_call_operand.vmem [shape: s32[10,8], index: 1, kind: input, shape index: {}]   ;;  %s632_s2 = inlined_call_operand.hbm [shape: f32[8,128], index: 2, kind: output, shape index: {}]  }
   0x1   :  { %s562_s11 = smov 0  }
   0x2 LB: > { %s418_s12 = sadd.s32 4294967295, %s536_s11   ;;  %s22_s13 = sadd.s32 1, %s532_s10  ;;  %s536_s11 = sphi %s562_s11, %s13_s11   ;;  %s532_s10 = sphi %s560_s10, %s635_s10   ;;  %s528_s9 = sphi %s558_s9, %s634_s9  }
   0x3   : > { %p23_p0 = scmp.ge.s32.totalorder %s22_s13, 2  ;;  %p421_p1 = scmp.ge.s32.totalorder %s536_s11, 1 }
   0x4   : > { %p165_p2 = scmp.lt.s32.totalorder %s536_s11, 3 }
   0x5   : > { %s637_s13 = smov (%p23_p0, %s22_s13), 0 }
   0x6   : > { %p166_p3 = pnand %p421_p1, %p165_p2 }
   0x7   : > { %p195_p4 = scmp.lt.s32.totalorder (!%p166_p3), %s528_s9, 1  ;;  %p430_p5 = scmp.ne.s32.totalorder (!%p166_p3), %s528_s9, 0 }
   0x8   : > { %169 = sbr.rel (%p166_p3) target bundleno = 502 (0x1f6), region = 28 }
   0xf   : > { %s196_s14 = scalar_select %p195_p4, %s528_s9, 1 }
  0x10   : > { %220 = sbr.rel (%p430_p5) target bundleno = 23 (0x17), region = 32  ;;  %v538_v0 = vmov (!%p430_p5), 0.0  }
  0x11   : > { %s639_s14 = smov (!%p195_p4, %s196_s14), 1  ;;  %221 = vst [vmem:[#allocation2] sm:$0x1] (!%p430_p5), %v538_v0 }
  0x12   : > { %s425_s15 = sshll.u32 %s639_s14, 3 }
  0x13   : > { %s584_s18 = scalar_lea.vmem %s630_s0, %s425_s15  ;;  %s212_s21 = scalar_lea.vmem %s631_s1, %s425_s15 }
  0x17 PF: > { %v227_v1 = vlaneseq  ;;  %s431_s22 = sshll.u32 %s528_s9, 3  ;;  %v539_v2 = vmov 0.0   ;;  %vm540_vm0 = vmmov 0   ;;  %v223_v7 = vld [vmem:[%s212_s21] sm:$0xff]  ;;  %vm243_vm4 = vcmask 64512   ;;  %p435_p6 = scmp.ne.s32.totalorder %s528_s9, 1 }
  0x18   : > { %442 = vmatprep.subr.mxu0 %v539_v2  ;;  %444 = vmatprep.mubr.msk.f32.mxu0 %vm540_vm0, %v539_v2  ;;  %v229_v3 = vstv %s431_s22  ;;  %v541_v12 = vmov 1.0   ;;  %v222_v14 = vld [vmem:[%s584_s18] sm:$0xff]  ;;  %vm334_vm7 = vcmask (!%p435_p6), 1040384  }
  0x19   : > { %v228_v4 = vshrl.u32 %v227_v1, 7  ;;  %v234_v5 = vand.u32 127, %v227_v1  ;;  %v320_v23 = vld [vmem:[#allocation2] sm:$0x1] }
  0x1b   : > { %v235_v6 = vmul.u32 16, %v228_v4  ;;  %v230_v8 = vadd.s32 %v229_v3, %v228_v4  ;;  %v317_v13 = vcvt.s32.f32 %v234_v5 }
  0x1d   : > { %v236_v9 = vsub.s32 %v234_v5, %v235_v6  ;;  %vm231_vm1 = vcmp.lt.s32.totalorder %v230_v8, 10 }
  0x1e   : > { %v232_v10 = vsel %vm231_vm1, %v223_v7, 4294967295 }
  0x1f   : > { %vm237_vm2 = vcmp.ge.s32.totalorder %v236_v9, 0  ;;  %vm238_vm3 = vcmp.lt.s32.totalorder %v236_v9, 16  ;;  %v242_v11 = vcvt.s32.f32 %v232_v10 }
  0x20   : > { %vm239_vm5 = vmand %vm237_vm2, %vm238_vm3 }
  0x21   : > { %443 = vmatpush3.msk.msra.mxu0 %vm239_vm5, %v541_v12 }
  0x22   : > { %445 = vmatmul.mubr.msk.f32.vlgmr.msra.gmra.mrb[0].mxu0 %vm243_vm4, %v242_v11 }
  0xf5   : > { %v313_v15 = vpop.f32.mrb[0].mxu0 }
  0xf6   : > { %vm318_vm6 = vcmp.eq.f32.partialorder %v313_v15, %v317_v13  ;;  %v446_v16 = vpop.f32.mrb[1].mxu0 }
  0xf7   : > { %v319_v17 = vsel %vm318_vm6, %v222_v14, 0.0 }
  0xf8   : > { %v321_v18 = vrot.slane %v319_v17, 4 }
  0xfa   : > { %v322_v19 = vadd.f32 %v321_v18, %v319_v17 }
  0xfc   : > { %v323_v20 = vrot.slane %v322_v19, 2 }
  0xfe   : > { %v324_v21 = vadd.f32 %v323_v20, %v322_v19 }
 0x100   : > { %v325_v22 = vrot.slane %v324_v21, 1  ;;  %332 = sbr.rel (%p435_p6) target bundleno = 477 (0x1dd), region = 36 }
 0x102   : > { %v326_v24 = vadd.f32 %v325_v22, %v324_v21 }
 0x104   : > { %v327_v25 = vadd.f32 %v326_v24, %v320_v23 }
 0x106   : > { %328 = vst [vmem:[#allocation2] sm:$0x1] %v327_v25 }
 0x10d   : > { %v333_v26 = vld [vmem:[#allocation2] sm:$0x1] }
 0x10e   : > { %v335_v27 = vsel %vm334_vm7, %v333_v26, 0.0 }
 0x10f   : > { %336 = vadd.xlane.f32.xlu0 %v335_v27 }
 0x19c   : > { %v337_v28 = vpop.xlane.xlu0 %336 }
 0x19d   : > { %v338_v29 = vrot.slane %v337_v28, 4 }
 0x19f   : > { %v339_v30 = vadd.f32 %v338_v29, %v337_v28 }
 0x1a1   : > { %v340_v31 = vrot.slane %v339_v30, 2 }
 0x1a3   : > { %v341_v32 = vadd.f32 %v340_v31, %v339_v30 }
 0x1a5   : > { %v342_v33 = vrot.slane %v341_v32, 1 }
 0x1a7   : > { %v343_v34 = vadd.f32 %v342_v33, %v341_v32 }
 0x1a9   : > { %447 = vpush %v343_v34 }
 0x1da   : > { %s448_s23 = spop %447 }
 0x1db   : > { %v345_v35 = vstv %s448_s23 }
 0x1dc   : > { %346 = vst [vmem:[#allocation3] sm:$0xff] %v345_v35 }
 0x1dd PF: > { %p595_p7 = scmp.eq.s32.totalorder %s418_s12, 1  ;;  %s542_s25 = smov [#allocation3]  }
 0x1de   : > { %s356_s26 = sshll.u32 %s542_s25, 4  ;;  %s357_s26 = int_to_ptr.vmem [resolvable:$true] %s356_s26 }
 0x1df   : > { %s484_s27 = scalar_lea.vmem %s357_s26, 128  ;;  %p491_p11 = scmp.lt.s32.totalorder %s357_s26, %s357_s26 }
 0x1e0   : > { %p485_p8 = scmp.ne.s32.totalorder %s357_s26, %s484_s27  ;;  %p492_p12 = scmp.lt.s32.totalorder %s484_s27, %s484_s27 }
 0x1e2   : > { %p486_p9 = pnand %p485_p8, %p595_p7  ;;  %p493_p13 = por %p492_p12, %p491_p11 }
 0x1e4   : > { %p487_p10 = pneg %p486_p9 }
 0x1e6   : > { %p494_p0 = pnand %p493_p13, %p487_p10 }
 0x1e8   : > { %497 = shalt.err (!%p494_p0)
}
 0x1e9   : > { %s498_s30 = scalar_lea.hbm %s632_s2, 128 }
 0x1ea   : > { %p499_p1 = scmp.ne.s32.totalorder %s632_s2, %s498_s30  ;;  %p504_p4 = scmp.lt.u32.totalorder %s498_s30, %s632_s2 }
 0x1ec   : > { %p500_p2 = pnand %p499_p1, %p595_p7 }
 0x1ee   : > { %p501_p3 = pneg %p500_p2 }
 0x1f0   : > { %p506_p5 = pnand %p504_p4, %p501_p3 }
 0x1f2   : > { %509 = shalt.err (!%p506_p5)
}
 0x1f3   : > { %450 = dma.vmem_to_hbm [thread:$0]  (%p595_p7), %s357_s26, 128, %s632_s2, [#allocation4]  }
 0x1f4   : > { %523 = dma.done.wait (%p595_p7), [#allocation4], 128  }
 0x1f5   : > { %525 = vsyncadd (%p595_p7), [#allocation4], 4294967168 }
 0x1f6 PF: > { %s13_s11 = sadd.s32 1, %s536_s11   ;;  %s634_s9 = smov %s532_s10 }
 0x1f7   : > { %p10_p6 = scmp.ge.s32.totalorder %s13_s11, 4   ;;  %s635_s10 = smov %s637_s13 }
 0x1f9   :  { %12 = sbr.rel (!%p10_p6) target bundleno = 2 (0x2), region = 67 }
 0x200   :  { %369 = vsyncpa [#allocation4], 1 }
 0x201   :  { %371 = vsyncpa [#allocation4 + $0x1], 1 }

</bundles_post_ra>
